<compile_context>
chip_gen: v7x
topology: tpu7x:2x2x1
jax: 0.10.0
libtpu: 0.0.40
codegen_flags: <defaults>
</compile_context>

<pallas_src>
import functools

import jax
import jax.numpy as jnp
from jax.experimental import pallas as pl
from jax.experimental.pallas import tpu as pltpu


def _prenorm_ln_kernel(x_ref, gamma_ref, beta_ref, o_ref, *, eps):
    """LayerNorm over the last dim of a (row_tile, D) block.

    x_ref:     (TM, D)  input rows
    gamma_ref: (1, D)   LayerNorm weight
    beta_ref:  (1, D)   LayerNorm bias
    o_ref:     (TM, D)  normalized output
    """
    x = x_ref[...].astype(jnp.float32)                       # (TM, D)
    mean = jnp.mean(x, axis=-1, keepdims=True)               # XLU reduce
    xc = x - mean
    var = jnp.mean(xc * xc, axis=-1, keepdims=True)          # biased var (torch LN)
    inv = jax.lax.rsqrt(var + eps)                           # EUP, off the VALU path
    y = xc * inv * gamma_ref[...] + beta_ref[...]
    o_ref[...] = y.astype(o_ref.dtype)


def _row_tile(n):
    """Largest power-of-two row tile (multiple of 8 sublanes) dividing n."""
    for cand in (1024, 512, 256, 128, 64, 32, 16, 8):
        if n >= cand and n % cand == 0:
            return cand
    return n  # tiny / ragged batch: single block equal to the full array


@functools.partial(jax.jit, static_argnames=("eps",))
def layer_norm_pallas(x, gamma, beta, eps=1e-5):
    """nn.LayerNorm(dim) forward over the last axis of x (any leading shape)."""
    orig_shape = x.shape
    D = orig_shape[-1]
    x2 = x.reshape(-1, D)
    N = x2.shape[0]
    tm = _row_tile(N)

    kernel = functools.partial(_prenorm_ln_kernel, eps=float(eps))
    out = pl.pallas_call(
        kernel,
        out_shape=jax.ShapeDtypeStruct((N, D), x.dtype),
        grid_spec=pltpu.PrefetchScalarGridSpec(
            num_scalar_prefetch=0,
            grid=(N // tm,),
            in_specs=[
                pl.BlockSpec((tm, D), lambda i: (i, 0)),   # row tile of x
                pl.BlockSpec((1, D), lambda i: (0, 0)),    # gamma (resident)
                pl.BlockSpec((1, D), lambda i: (0, 0)),    # beta  (resident)
            ],
            out_specs=pl.BlockSpec((tm, D), lambda i: (i, 0)),
        ),
        compiler_params=pltpu.CompilerParams(
            dimension_semantics=("parallel",),  # independent row tiles (megacore on v7x)
        ),
    )(x2, gamma.reshape(1, D), beta.reshape(1, D))
    return out.reshape(orig_shape)


def prenorm_forward(x, gamma, beta, fn=None, eps=1e-5, **kwargs):
    """PreNorm.forward: fn(LayerNorm(x), **kwargs)."""
    y = layer_norm_pallas(x, gamma, beta, eps=eps)
    # TODO(synk): `self.fn` is an arbitrary wrapped nn.Module (Attention /
    # FeedForward in TinyHAR); it is applied here as a user-supplied JAX
    # callable on the normalized output, not translated into the kernel.
    return fn(y, **kwargs) if fn is not None else y


def _layer_norm_ref(x, gamma, beta, eps=1e-5):
    """Pure-JAX reference matching torch.nn.LayerNorm semantics."""
    mean = jnp.mean(x, axis=-1, keepdims=True)
    var = jnp.mean((x - mean) ** 2, axis=-1, keepdims=True)
    return (x - mean) * jax.lax.rsqrt(var + eps) * gamma + beta


if __name__ == "__main__":
    # Shapes consistent with TinyHAR's PreNorm usage: tokens over sensor
    # channels with dim = filter_num.
    B, C, D = 2, 4, 32  # batch, tokens (sensor channels), dim = filter_num

    key = jax.random.PRNGKey(0)
    kx, kg, kb = jax.random.split(key, 3)
    x = jax.random.normal(kx, (B, C, D), jnp.float32)
    # nn.LayerNorm default init is gamma=1, beta=0; perturb so the affine path
    # is actually exercised.
    gamma = 1.0 + 0.1 * jax.random.normal(kg, (D,), jnp.float32)
    beta = 0.1 * jax.random.normal(kb, (D,), jnp.float32)

    out = prenorm_forward(x, gamma, beta, fn=None)
    out = jax.block_until_ready(out)

    ref = _layer_norm_ref(x, gamma, beta)
    assert out.shape == (B, C, D)
    assert jnp.allclose(out, ref, atol=1e-5, rtol=1e-5), "Pallas LayerNorm mismatch"

    # Exercise the wrapped-fn path: PreNorm applies fn to the normalized input.
    out_fn = jax.block_until_ready(prenorm_forward(x, gamma, beta, fn=jax.nn.gelu))
    assert jnp.allclose(out_fn, jax.nn.gelu(ref), atol=1e-5, rtol=1e-5), "PreNorm(fn) mismatch"

    print("KERNEL_OK")
</pallas_src>

<mosaic_0001>
module attributes {stable_mosaic.version = 11 : i64} {
  func.func @_prenorm_ln_kernel(%arg0: i32, %arg1: memref<8x32xf32, #tpu.memory_space<vmem>>, %arg2: memref<1x32xf32, #tpu.memory_space<vmem>>, %arg3: memref<1x32xf32, #tpu.memory_space<vmem>>, %arg4: memref<8x32xf32, #tpu.memory_space<vmem>>) attributes {dimension_semantics = [#tpu.dimension_semantics<parallel>], iteration_bounds = array<i64: 1>, scalar_prefetch = 0 : i64, scratch_operands = 0 : i64, tpu.core_type = #tpu.core_type<tc>, window_params = [{transform_indices = @transform_0, window_bounds = array<i64: 8, 32>}, {pipeline_mode = #tpu.pipeline_mode<synchronous>, transform_indices = @transform_1, window_bounds = array<i64: 1, 32>}, {pipeline_mode = #tpu.pipeline_mode<synchronous>, transform_indices = @transform_2, window_bounds = array<i64: 1, 32>}, {transform_indices = @transform_3, window_bounds = array<i64: 8, 32>}]} {
    %c0 = arith.constant 0 : index
    %c0_0 = arith.constant 0 : index
    %0 = vector.load %arg1[%c0, %c0_0] : memref<8x32xf32, #tpu.memory_space<vmem>>, vector<8x32xf32>
    %cst = arith.constant dense<0.000000e+00> : vector<8xf32>
    %1 = vector.multi_reduction <add>, %0, %cst [1] : vector<8x32xf32> to vector<8xf32>
    %2 = vector.shape_cast %1 : vector<8xf32> to vector<8x1xf32>
    %cst_1 = arith.constant 3.200000e+01 : f32
    %3 = vector.broadcast %cst_1 : f32 to vector<8x1xf32>
    %4 = arith.divf %2, %3 : vector<8x1xf32>
    %5 = vector.broadcast %4 : vector<8x1xf32> to vector<8x32xf32>
    %6 = arith.subf %0, %5 : vector<8x32xf32>
    %7 = arith.mulf %6, %6 : vector<8x32xf32>
    %cst_2 = arith.constant dense<0.000000e+00> : vector<8xf32>
    %8 = vector.multi_reduction <add>, %7, %cst_2 [1] : vector<8x32xf32> to vector<8xf32>
    %9 = vector.shape_cast %8 : vector<8xf32> to vector<8x1xf32>
    %cst_3 = arith.constant 3.200000e+01 : f32
    %10 = vector.broadcast %cst_3 : f32 to vector<8x1xf32>
    %11 = arith.divf %9, %10 : vector<8x1xf32>
    %cst_4 = arith.constant 9.99999974E-6 : f32
    %12 = vector.broadcast %cst_4 : f32 to vector<8x1xf32>
    %13 = arith.addf %11, %12 : vector<8x1xf32>
    %14 = math.rsqrt %13 : vector<8x1xf32>
    %15 = vector.broadcast %14 : vector<8x1xf32> to vector<8x32xf32>
    %16 = arith.mulf %6, %15 : vector<8x32xf32>
    %c0_5 = arith.constant 0 : index
    %c0_6 = arith.constant 0 : index
    %17 = vector.load %arg2[%c0_5, %c0_6] : memref<1x32xf32, #tpu.memory_space<vmem>>, vector<1x32xf32>
    %18 = vector.broadcast %17 : vector<1x32xf32> to vector<8x32xf32>
    %19 = arith.mulf %16, %18 : vector<8x32xf32>
    %c0_7 = arith.constant 0 : index
    %c0_8 = arith.constant 0 : index
    %20 = vector.load %arg3[%c0_7, %c0_8] : memref<1x32xf32, #tpu.memory_space<vmem>>, vector<1x32xf32>
    %21 = vector.broadcast %20 : vector<1x32xf32> to vector<8x32xf32>
    %22 = arith.addf %19, %21 : vector<8x32xf32>
    %c0_9 = arith.constant 0 : index
    %c0_10 = arith.constant 0 : index
    %23 = vector.load %arg4[%c0_9, %c0_10] : memref<8x32xf32, #tpu.memory_space<vmem>>, vector<8x32xf32>
    tpu.vector_store %arg4[%c0_9, %c0_10], %22 {strides = array<i32>} : memref<8x32xf32, #tpu.memory_space<vmem>>, vector<8x32xf32>,
    return
  }
  func.func @transform_0(%arg0: i32) -> (i32, i32) {
    %c0_i32 = arith.constant 0 : i32
    %c0_i32_0 = arith.constant 0 : i32
    return %arg0, %c0_i32 : i32, i32
  }
  func.func @transform_1(%arg0: i32) -> (i32, i32) {
    %c0_i32 = arith.constant 0 : i32
    %c0_i32_0 = arith.constant 0 : i32
    %c0_i32_1 = arith.constant 0 : i32
    return %c0_i32, %c0_i32_0 : i32, i32
  }
  func.func @transform_2(%arg0: i32) -> (i32, i32) {
    %c0_i32 = arith.constant 0 : i32
    %c0_i32_0 = arith.constant 0 : i32
    %c0_i32_1 = arith.constant 0 : i32
    return %c0_i32, %c0_i32_0 : i32, i32
  }
  func.func @transform_3(%arg0: i32) -> (i32, i32) {
    %c0_i32 = arith.constant 0 : i32
    %c0_i32_0 = arith.constant 0 : i32
    return %arg0, %c0_i32 : i32, i32
  }
}

</mosaic_0001>

<bundles_post_ra>
// kernel: layer_norm_pallas.1
= control target key start
LH: loop header
LB: loop body
LE: loop exit
PB: predicated region body
PF: predicated region fallthrough
CT: control target
= control target key end

     0   :  { %vm16_vm0 = vcmask 261120   ;;  %s136_s0 = inlined_call_operand.vmem [shape: f32[8,32], index: 0, kind: input, shape index: {}]   ;;  %s137_s1 = inlined_call_operand.vmem [shape: f32[1,32], index: 1, kind: input, shape index: {}]   ;;  %s138_s2 = inlined_call_operand.vmem [shape: f32[1,32], index: 2, kind: input, shape index: {}]   ;;  %s139_s3 = inlined_call_operand.hbm [shape: f32[8,32], index: 3, kind: output, shape index: {}]  }
   0x1   :  { %v15_v0 = vld [vmem:[%s136_s0] sm:$0xff] }
   0x2   :  { %8 = vsyncpa [#allocation3], 0  ;;  %v17_v1 = vsel %vm16_vm0, %v15_v0, 0.0  ;;  %v62_v11 = vld [vmem:[%s137_s1] ss:$0 sm:$0xff]  ;;  %s91_s17 = smov [#allocation2]  }
   0x3   :  { %18 = vadd.xlane.f32.xlu0 %v17_v1  ;;  %v63_v13 = vld [vmem:[%s138_s2] ss:$0 sm:$0xff]  ;;  %s54_s18 = sshll.u32 %s91_s17, 4  ;;  %s55_s18 = int_to_ptr.vmem [resolvable:$true] %s54_s18 }
   0x4   :  { %s67_s19 = scalar_lea.vmem %s55_s18, 128  ;;  %p72_p1 = scmp.lt.s32.totalorder %s55_s18, %s55_s18 }
   0x5   :  { %p68_p0 = scmp.ne.s32.totalorder %s55_s18, %s67_s19  ;;  %p73_p2 = scmp.lt.s32.totalorder %s67_s19, %s67_s19 }
   0x7   :  { %p74_p3 = por %p73_p2, %p72_p1 }
   0x9   :  { %p75_p4 = pnand %p74_p3, %p68_p0 }
  0x90   :  { %v19_v2 = vpop.xlane.xlu0 %18 }
  0x91   :  { %v21_v3 = vmul.f32 0.03125, %v19_v2 }
  0x93   :  { %v22_v4 = vsub.f32 %v15_v0, %v21_v3 }
  0x95   :  { %v23_v5 = vmul.f32 %v22_v4, %v22_v4 }
  0x97   :  { %v24_v6 = vsel %vm16_vm0, %v23_v5, 0.0 }
  0x98   :  { %25 = vadd.xlane.f32.xlu0 %v24_v6 }
 0x125   :  { %v26_v7 = vpop.xlane.xlu0 %25 }
 0x126   :  { %v27_v8 = vmul.f32 0.03125, %v26_v7 }
 0x128   :  { %v28_v9 = vadd.f32 1e-05, %v27_v8 }
 0x12a   :  { %65 = vrsqrt.f32 %v28_v9 }
 0x134   :  { %v66_v10 = vpop.eup %65 }
 0x135   :  { %v30_v12 = vmul.f32 %v66_v10, %v22_v4 }
 0x137   :  { %v38_v14 = vmul.f32 %v62_v11, %v30_v12 }
 0x139   :  { %v46_v15 = vadd.f32 %v63_v13, %v38_v14 }
 0x13b   :  { %47 = vst.msk [vmem:[#allocation2] sm:$0xff] %vm16_vm0, %v46_v15 }
 0x13c   :  { %78 = shalt.err (!%p75_p4)
}
 0x13d   :  { %s79_s21 = scalar_lea.hbm %s139_s3, 128 }
 0x13e   :  { %p80_p5 = scmp.ne.s32.totalorder %s139_s3, %s79_s21  ;;  %p83_p6 = scmp.lt.u32.totalorder %s79_s21, %s139_s3 }
 0x140   :  { %p85_p7 = pnand %p83_p6, %p80_p5 }
 0x142   :  { %88 = shalt.err (!%p85_p7)
}
 0x143   :  { %57 = dma.vmem_to_hbm [thread:$0]  %s55_s18, 128, %s139_s3, [#allocation3]  }
 0x144   :  { %89 = dma.done.wait [#allocation3], 128  }
 0x145   :  { %90 = vsyncadd [#allocation3], 4294967168 }
 0x146   :  { %61 = vsyncpa [#allocation3], 1 }

</bundles_post_ra>
